<compile_context>
chip_gen: v7x
topology: tpu7x:2x2x1
jax: 0.10.0
libtpu: 0.0.40
codegen_flags: <defaults>
</compile_context>

<pallas_src>
import jax
import jax.numpy as jnp
import numpy as np
from jax import lax
from jax.experimental import pallas as pl
from jax.experimental.pallas import tpu as pltpu


def _round_up(x: int, m: int) -> int:
    return ((x + m - 1) // m) * m


def _sublane(dtype) -> int:
    """Minimal sublane multiple for the second-to-last tile dim (dtype-aware)."""
    itemsize = jnp.dtype(dtype).itemsize
    return max(8, 32 // itemsize)  # 8 for f32, 16 for bf16, 32 for int8/fp8


def _pick_tile(dim: int, cap: int, align: int) -> int:
    """Tile for `dim`: the full dim if its aligned size fits under `cap`
    (single block, zero waste / no OOB), otherwise the multiple of `align`
    <= cap that minimizes padded / out-of-bounds waste (ties -> larger tile)."""
    if _round_up(dim, align) <= cap:
        return dim
    best, best_key = align, None
    c = align
    while c <= cap:
        key = (_round_up(dim, c) - dim, -c)
        if best_key is None or key < best_key:
            best, best_key = c, key
        c += align
    return best


def _make_kernel(has_bias: bool, direct_out: bool, mxu_dtype):
    """Build the kernel body.  direct_out=True accumulates straight into the
    resident f32 output block (no scratch); otherwise an f32 VMEM scratch is
    used and copied/cast at finalize."""

    def kernel(*refs):
        if has_bias:
            x_ref, lw_ref, b_ref = refs[:3]
            o_ref = refs[3]
        else:
            x_ref, lw_ref = refs[:2]
            b_ref = None
            o_ref = refs[2]
        acc_ref = o_ref if direct_out else refs[-1]

        k = pl.program_id(2)

        @pl.when(k == 0)
        def _init():
            acc_ref[...] = jnp.zeros_like(acc_ref)

        # Square the log-weight tile in f32 on the VPU (hidden under the MXU),
        # then optionally down-cast the MXU operands (bf16 on v6e/v7x).
        w = lw_ref[...].astype(jnp.float32)
        w_sq = w * w
        op_dtype = mxu_dtype if mxu_dtype is not None else jnp.float32
        acc_ref[...] += lax.dot_general(
            x_ref[...].astype(op_dtype), w_sq.astype(op_dtype),
            dimension_numbers=(((1,), (1,)), ((), ())),   # contract K with K
            preferred_element_type=jnp.float32)

        if has_bias or not direct_out:
            @pl.when(k == pl.num_programs(2) - 1)
            def _finalize():
                res = acc_ref[...]
                if has_bias:
                    res = res + b_ref[...]        # (1, tn) broadcasts over rows
                o_ref[...] = res.astype(o_ref.dtype)

    return kernel


def positive_linear(x, log_weight, bias=None, *, tm=512, tn=512, tk=1024,
                    mxu_dtype=None, out_dtype=None):
    """y = x @ (log_weight**2).T [+ bias] via a tiled Pallas TPU kernel.

    x:          (B, in_features)
    log_weight: (out_features, in_features)
    bias:       optional (out_features,)
    tm/tn/tk:   tile-size caps (actual tiles chosen to minimize waste)
    mxu_dtype:  optional MXU operand dtype (e.g. jnp.bfloat16); None = exact f32
    """
    B, K = x.shape
    N, K2 = log_weight.shape
    assert K == K2, "in_features mismatch"
    out_dtype = out_dtype or x.dtype

    x_bytes = jnp.dtype(x.dtype).itemsize
    w_bytes = jnp.dtype(log_weight.dtype).itemsize
    o_bytes = jnp.dtype(out_dtype).itemsize
    sub = _sublane(x.dtype)
    has_bias = bias is not None
    direct_out = jnp.dtype(out_dtype) == jnp.dtype(jnp.float32)

    def vmem_est(a, b, c):
        v = 2 * a * c * x_bytes + 2 * b * c * w_bytes + 2 * a * b * o_bytes
        if not direct_out:
            v += a * b * 4
        if has_bias:
            v += 2 * b * 4
        return v

    # Keep double-buffered tiles well inside VMEM on every generation
    # (v5e scoped default 16 MiB; v7x physical 64 MiB).
    BUDGET = 28 * 1024 * 1024
    while vmem_est(tm, tn, tk) > BUDGET:
        if tk > 256:
            tk = max(256, _round_up(tk // 2, 128))
        elif tn > 256:
            tn = max(256, _round_up(tn // 2, 128))
        elif tm > 2 * sub:
            tm = max(sub, _round_up(tm // 2, sub))
        else:
            break

    # Pick the actual tiles (minimal waste within the caps).
    tm = _pick_tile(B, tm, sub)
    tn = _pick_tile(N, tn, 128)
    tk = _pick_tile(K, tk, 128)

    grid_m = pl.cdiv(B, tm)
    grid_n = pl.cdiv(N, tn)

    # Make sure the parallel grid has >= 2 blocks when N is wide so both of
    # v7x's TensorCores get work (no effect on single-TC v5e/v6e).
    if grid_m == 1 and grid_n == 1 and _round_up(N, 128) >= 512:
        tn = _round_up(_round_up(N, 128) // 2, 128)
        grid_n = pl.cdiv(N, tn)

    # K is the only axis that must be zero-padded for correctness (garbage in
    # OOB K columns would corrupt real outputs).  M / N edge blocks only touch
    # rows / cols that are masked off on store, so they are left ragged.
    if tk == K:
        xp, lwp = x, log_weight
        Kp = K
    else:
        Kp = _round_up(K, tk)
        xp = x if Kp == K else jnp.pad(x, ((0, 0), (0, Kp - K)))
        lwp = log_weight if Kp == K else jnp.pad(log_weight,
                                                 ((0, 0), (0, Kp - K)))
    grid_k = Kp // tk
    grid = (grid_m, grid_n, grid_k)

    cost = pl.CostEstimate(
        flops=2 * B * N * K + grid_m * N * K,          # matmul + weight squaring
        transcendentals=0,
        bytes_accessed=(grid_n * B * K * x_bytes       # x re-streamed per N block
                        + grid_m * N * K * w_bytes     # weight re-streamed per M block
                        + B * N * o_bytes))

    cp_kwargs = dict(dimension_semantics=("parallel", "parallel", "arbitrary"))
    vmem_needed = vmem_est(tm, tn, tk)
    if vmem_needed > 14 * 1024 * 1024:
        # Above v5e's 16 MiB scoped default; keep headroom under v7x's 64 MiB.
        cp_kwargs["vmem_limit_bytes"] = int(min(vmem_needed * 1.5,
                                                48 * 1024 * 1024))
    cparams = pltpu.CompilerParams(**cp_kwargs)

    kernel = _make_kernel(has_bias, direct_out, mxu_dtype)

    in_specs = [
        pl.BlockSpec((tm, tk), lambda i, j, k: (i, k)),
        pl.BlockSpec((tn, tk), lambda i, j, k: (j, k)),
    ]
    args = [xp, lwp]
    if has_bias:
        in_specs.append(pl.BlockSpec((1, tn), lambda i, j, k: (0, j)))
        args.append(bias.reshape(1, N).astype(jnp.float32))

    scratch_shapes = [] if direct_out else [pltpu.VMEM((tm, tn), jnp.float32)]

    return pl.pallas_call(
        kernel,
        out_shape=jax.ShapeDtypeStruct((B, N), out_dtype),
        grid_spec=pltpu.PrefetchScalarGridSpec(
            num_scalar_prefetch=0,
            grid=grid,
            in_specs=in_specs,
            out_specs=pl.BlockSpec((tm, tn), lambda i, j, k: (i, j)),
            scratch_shapes=scratch_shapes,
        ),
        compiler_params=cparams,
        cost_estimate=cost,
    )(*args)


def init_positive_linear_params(key, in_features, out_features, bias=False):
    """Deterministic re-implementation of PositiveLinear.reset_parameters()."""
    k_w, k_b = jax.random.split(key)
    # xavier_uniform_: U(-a, a), a = sqrt(6 / (fan_in + fan_out))
    a = np.sqrt(6.0 / (in_features + out_features))
    lw = jax.random.uniform(
        k_w, (out_features, in_features), minval=-a, maxval=a,
        dtype=jnp.float32)
    b = None
    if bias:
        bound = np.sqrt(1.0 / np.sqrt(in_features))
        b = jax.random.uniform(
            k_b, (out_features,), minval=-bound, maxval=bound,
            dtype=jnp.float32)
    # log_weight.data.abs_().sqrt_()
    lw = jnp.sqrt(jnp.abs(lw))
    return lw, b


if __name__ == "__main__":
    key = jax.random.PRNGKey(0)
    k_p1, k_p2, k_p3, k_x1, k_x2, k_x3 = jax.random.split(key, 6)

    # --- Test 1: module-default tiny shapes, no bias, single full-dim block --
    B1, K1, N1 = 8, 32, 16
    lw1, _ = init_positive_linear_params(k_p1, K1, N1, bias=False)
    x1 = jax.random.normal(k_x1, (B1, K1), dtype=jnp.float32)
    y1 = jax.block_until_ready(positive_linear(x1, lw1, None))
    y1_ref = x1 @ (lw1 ** 2).T
    np.testing.assert_allclose(np.asarray(y1), np.asarray(y1_ref),
                               rtol=1e-5, atol=1e-5)

    # --- Test 2: unaligned multi-block (M, N, K) grid with bias, ragged N ----
    B2, K2, N2 = 200, 384, 320
    lw2, b2 = init_positive_linear_params(k_p2, K2, N2, bias=True)
    x2 = jax.random.normal(k_x2, (B2, K2), dtype=jnp.float32)
    # Small explicit tile caps to force a real (M, N, K) grid + K accumulation.
    y2 = jax.block_until_ready(
        positive_linear(x2, lw2, b2, tm=64, tn=128, tk=128))
    y2_ref = x2 @ (lw2 ** 2).T + b2[None, :]
    np.testing.assert_allclose(np.asarray(y2), np.asarray(y2_ref),
                               rtol=1e-4, atol=1e-4)

    # --- Test 3: K not a multiple of the K tile -> zero-padded K path --------
    B3, K3, N3 = 16, 200, 96
    lw3, _ = init_positive_linear_params(k_p3, K3, N3, bias=False)
    x3 = jax.random.normal(k_x3, (B3, K3), dtype=jnp.float32)
    y3 = jax.block_until_ready(positive_linear(x3, lw3, None, tk=128))
    y3_ref = x3 @ (lw3 ** 2).T
    np.testing.assert_allclose(np.asarray(y3), np.asarray(y3_ref),
                               rtol=1e-4, atol=1e-4)

    print("KERNEL_OK")
</pallas_src>

<mosaic_0001>
module attributes {stable_mosaic.version = 11 : i64} {
  func.func @kernel(%arg0: i32, %arg1: i32, %arg2: i32, %arg3: memref<8x32xf32, #tpu.memory_space<vmem>>, %arg4: memref<16x32xf32, #tpu.memory_space<vmem>>, %arg5: memref<8x16xf32, #tpu.memory_space<vmem>>) attributes {dimension_semantics = [#tpu.dimension_semantics<parallel>, #tpu.dimension_semantics<parallel>, #tpu.dimension_semantics<arbitrary>], iteration_bounds = array<i64: 1, 1, 1>, scalar_prefetch = 0 : i64, scratch_operands = 0 : i64, tpu.core_type = #tpu.core_type<tc>, window_params = [{transform_indices = @transform_0, window_bounds = array<i64: 8, 32>}, {transform_indices = @transform_1, window_bounds = array<i64: 16, 32>}, {transform_indices = @transform_2, window_bounds = array<i64: 8, 16>}]} {
    %c0_i32 = arith.constant 0 : i32
    %0 = arith.cmpi eq, %arg2, %c0_i32 : i32
    %1 = arith.extui %0 : i1 to i32
    %c0_i32_0 = arith.constant 0 : i32
    %2 = arith.cmpi ne, %1, %c0_i32_0 : i32
    scf.if %2 {
      %cst_8 = arith.constant 0.000000e+00 : f32
      %10 = vector.broadcast %cst_8 : f32 to vector<8x16xf32>
      %c0_9 = arith.constant 0 : index
      %c0_10 = arith.constant 0 : index
      %11 = vector.load %arg5[%c0_9, %c0_10] : memref<8x16xf32, #tpu.memory_space<vmem>>, vector<8x16xf32>
      tpu.vector_store %arg5[%c0_9, %c0_10], %10 {strides = array<i32>} : memref<8x16xf32, #tpu.memory_space<vmem>>, vector<8x16xf32>,
    } else {
    }
    %c0 = arith.constant 0 : index
    %c0_1 = arith.constant 0 : index
    %3 = vector.load %arg4[%c0, %c0_1] : memref<16x32xf32, #tpu.memory_space<vmem>>, vector<16x32xf32>
    %4 = arith.mulf %3, %3 : vector<16x32xf32>
    %c0_2 = arith.constant 0 : index
    %c0_3 = arith.constant 0 : index
    %5 = vector.load %arg5[%c0_2, %c0_3] : memref<8x16xf32, #tpu.memory_space<vmem>>, vector<8x16xf32>
    %c0_4 = arith.constant 0 : index
    %c0_5 = arith.constant 0 : index
    %6 = vector.load %arg3[%c0_4, %c0_5] : memref<8x32xf32, #tpu.memory_space<vmem>>, vector<8x32xf32>
    %cst = arith.constant dense<0.000000e+00> : vector<8x16xf32>
    %7 = tpu.matmul %6, %4, %cst {dimension_numbers = #tpu.dot_dimension_numbers<[1], [1], [0], [0], [0, 0, 1, 0], [], []>} : vector<8x32xf32>, vector<16x32xf32>, vector<8x16xf32> -> vector<8x16xf32>
    %8 = arith.addf %5, %7 : vector<8x16xf32>
    %c0_6 = arith.constant 0 : index
    %c0_7 = arith.constant 0 : index
    %9 = vector.load %arg5[%c0_6, %c0_7] : memref<8x16xf32, #tpu.memory_space<vmem>>, vector<8x16xf32>
    tpu.vector_store %arg5[%c0_6, %c0_7], %8 {strides = array<i32>} : memref<8x16xf32, #tpu.memory_space<vmem>>, vector<8x16xf32>,
    return
  }
  func.func @transform_0(%arg0: i32, %arg1: i32, %arg2: i32) -> (i32, i32) {
    %c0_i32 = arith.constant 0 : i32
    return %arg0, %arg2 : i32, i32
  }
  func.func @transform_1(%arg0: i32, %arg1: i32, %arg2: i32) -> (i32, i32) {
    %c0_i32 = arith.constant 0 : i32
    return %arg1, %arg2 : i32, i32
  }
  func.func @transform_2(%arg0: i32, %arg1: i32, %arg2: i32) -> (i32, i32) {
    %c0_i32 = arith.constant 0 : i32
    return %arg0, %arg1 : i32, i32
  }
}

</mosaic_0001>

<bundles_post_ra>
// kernel: tpu_custom_call.1
= control target key start
LH: loop header
LB: loop body
LE: loop exit
PB: predicated region body
PF: predicated region fallthrough
CT: control target
= control target key end

     0   :  { %7 = vsyncpa [#allocation3], 0  ;;  %s314_s0 = inlined_call_operand.hbm [shape: f32[8,32], index: 0, kind: input, shape index: {}]   ;;  %s315_s1 = inlined_call_operand.hbm [shape: f32[16,32], index: 1, kind: input, shape index: {}]   ;;  %s316_s2 = inlined_call_operand.hbm [shape: f32[8,16], index: 2, kind: output, shape index: {}]  }
   0x1   :  { %8 = vsyncpa [#allocation6], 0 }
   0x2   :  { %9 = vsyncpa [#allocation4], 0  ;;  %s246_s9 = smov [#allocation2]   ;;  %s247_s11 = smov [#allocation5]  }
   0x3   :  { %s16_s10 = sshll.u32 %s246_s9, 4  ;;  %s25_s12 = sshll.u32 %s247_s11, 4  ;;  %s17_s10 = int_to_ptr.vmem [resolvable:$true] %s16_s10  ;;  %s269_s12 = int_to_ptr.vmem [resolvable:$true] %s25_s12 }
   0x4   :  { %s174_s15 = scalar_lea.hbm %s314_s0, 128 }
   0x5   :  { %p175_p0 = scmp.ne.s32.totalorder %s314_s0, %s174_s15  ;;  %p178_p1 = scmp.lt.u32.totalorder %s174_s15, %s314_s0 }
   0x7   :  { %p180_p2 = pnand %p178_p1, %p175_p0 }
   0x9   :  { %183 = shalt.err (!%p180_p2)
}
   0xa   :  { %s184_s20 = scalar_lea.vmem %s17_s10, 128  ;;  %p189_p4 = scmp.lt.s32.totalorder %s17_s10, %s17_s10 }
   0xb   :  { %p185_p3 = scmp.ne.s32.totalorder %s17_s10, %s184_s20  ;;  %p190_p5 = scmp.lt.s32.totalorder %s184_s20, %s184_s20 }
   0xd   :  { %p191_p6 = por %p190_p5, %p189_p4 }
   0xf   :  { %p192_p7 = pnand %p191_p6, %p185_p3 }
  0x11   :  { %195 = shalt.err (!%p192_p7)
}
  0x12   :  { %19 = dma.hbm_to_vmem [thread:$0]  %s314_s0, 128, %s17_s10, [#allocation3]  }
  0x13   :  { %s196_s25 = scalar_lea.hbm %s315_s1, 256 }
  0x14   :  { %p197_p8 = scmp.ne.s32.totalorder %s315_s1, %s196_s25  ;;  %p200_p9 = scmp.lt.u32.totalorder %s196_s25, %s315_s1 }
  0x16   :  { %p202_p10 = pnand %p200_p9, %p197_p8 }
  0x18   :  { %205 = shalt.err (!%p202_p10)
}
  0x19   :  { %s206_s30 = scalar_lea.vmem %s269_s12, 256  ;;  %p211_p12 = scmp.lt.s32.totalorder %s269_s12, %s269_s12 }
  0x1a   :  { %p207_p11 = scmp.ne.s32.totalorder %s269_s12, %s206_s30  ;;  %p212_p13 = scmp.lt.s32.totalorder %s206_s30, %s206_s30 }
  0x1c   :  { %p213_p0 = por %p212_p13, %p211_p12 }
  0x1e   :  { %p214_p1 = pnand %p213_p0, %p207_p11 }
  0x20   :  { %217 = shalt.err (!%p214_p1)
}
  0x21   :  { %s248_s0 = smov 128   ;;  %s249_s3 = smov 8  }
  0x22   :  { %31 = dma.hbm_to_vmem [thread:$0]  %s315_s1, 256, %s269_s12, [#allocation6], %s248_s0, %s248_s0, %s249_s3  }
  0x23   :  { %240 = dma.done.wait [#allocation3], 128  }
  0x24   :  { %241 = vsyncadd [#allocation3], 4294967168 }
  0x25   :  { %242 = dma.done.wait [#allocation6], 256  }
  0x26   :  { %243 = vsyncadd [#allocation6], 4294967040  ;;  %vm42_vm0 = vcmask 130048   ;;  %v250_v0 = vmov 0.0|0.0   ;;  %v251_v1 = vmov 0.0   ;;  %vm252_vm1 = vmmov 0  }
  0x27   :  { %162 = vmatprep.subr.bf16.mxu0 %v250_v0  ;;  %43 = vst.msk [vmem:[#allocation7] sm:$0xff] %vm42_vm0, %v251_v1  ;;  %159 = vmatprep.mubr.msk.f32.mxu0 %vm252_vm1, %v251_v1  ;;  %vm50_vm2 = vcmask 261120   ;;  %v44_v2 = vld [vmem:[#allocation5] sm:$0xff]  ;;  %v45_v3 = vld [vmem:[#allocation5 + $0x8] sm:$0xff]  ;;  %v49_v7 = vld [vmem:[#allocation2] sm:$0xff]  ;;  %s253_s1 = smov [#allocation7]  }
  0x28   :  { %v46_v4 = vmul.f32 %v44_v2, %v44_v2  ;;  %v47_v5 = vmul.f32 %v45_v3, %v45_v3  ;;  %vm164_vm3 = vmpackc.low %vm50_vm2, %vm50_vm2  ;;  %s139_s6 = sshll.u32 %s253_s1, 4  ;;  %s140_s6 = int_to_ptr.vmem [resolvable:$true] %s139_s6 }
  0x29   :  { %s218_s7 = scalar_lea.vmem %s140_s6, 128  ;;  %p223_p3 = scmp.lt.s32.totalorder %s140_s6, %s140_s6 }
  0x2a   :  { %v163_v6 = vpack.c.bf16 %v47_v5, %v46_v4  ;;  %p219_p2 = scmp.ne.s32.totalorder %s140_s6, %s218_s7  ;;  %p224_p4 = scmp.lt.s32.totalorder %s218_s7, %s218_s7 }
  0x2c   :  { %165 = vmatpush3.bf16.xpose.msk.msra.mxu0 %vm164_vm3, %v163_v6  ;;  %p225_p5 = por %p224_p4, %p223_p3 }
  0x2e   :  { %v48_v8 = vld [vmem:[#allocation7] sm:$0xff]  ;;  %p226_p6 = pnand %p225_p5, %p219_p2 }
  0x33   :  { %160 = vmatmul.mubr.msk.f32.vlgmr.msra.gmra.mrb[0].mxu0 %vm50_vm2, %v49_v7 }
 0x106   :  { %v126_v9 = vpop.f32.mrb[0].mxu0 }
 0x107   :  { %v130_v10 = vadd.f32 %v126_v9, %v48_v8  ;;  %v161_v11 = vpop.f32.mrb[1].mxu0 }
 0x109   :  { %132 = vst.msk [vmem:[#allocation7] sm:$0xff] %vm42_vm0, %v130_v10 }
 0x10a   :  { %229 = shalt.err (!%p226_p6)
}
 0x10b   :  { %s230_s10 = scalar_lea.hbm %s316_s2, 128 }
 0x10c   :  { %p231_p7 = scmp.ne.s32.totalorder %s316_s2, %s230_s10  ;;  %p234_p8 = scmp.lt.u32.totalorder %s230_s10, %s316_s2 }
 0x10e   :  { %p236_p9 = pnand %p234_p8, %p231_p7 }
 0x110   :  { %239 = shalt.err (!%p236_p9)
}
 0x111   :  { %142 = dma.vmem_to_hbm [thread:$0]  %s140_s6, 128, %s316_s2, [#allocation4]  }
 0x112   :  { %244 = dma.done.wait [#allocation4], 128  }
 0x113   :  { %245 = vsyncadd [#allocation4], 4294967168 }
 0x114   :  { %146 = vsyncpa [#allocation3], 1 }
 0x115   :  { %147 = vsyncpa [#allocation6], 1 }
 0x116   :  { %148 = vsyncpa [#allocation4], 1 }

</bundles_post_ra>
